<compile_context>
chip_gen: v6e
topology: v6e:2x2x1
jax: 0.10.0
libtpu: 0.0.40
codegen_flags: <defaults>
</compile_context>

<pallas_src>
import functools

import numpy as np
import jax
import jax.numpy as jnp
from jax.experimental import pallas as pl
from jax.experimental.pallas import tpu as pltpu


# ----------------------------- helpers (glue / parameter setup) -----------------------------

def _adaptive_bins(size, k):
    """PyTorch AdaptiveAvgPool2d bin boundaries (static Python ints)."""
    starts = [(i * size) // k for i in range(k)]
    ends = [-((-(i + 1) * size) // k) for i in range(k)]   # ceil
    return starts, ends


def _pool_matrix_full_grid(H, W, HO, WO):
    """(35, H*W) lane-dense matrix implementing AdaptiveAvgPool2d(1), (3), (5) over the
    (HO, WO) valid-conv-output grid, laid out on the FULL flattened (H, W) grid.
    Invalid (border) positions get exactly-zero weight, masking in-kernel garbage there."""
    M = np.zeros((1 + 9 + 25, H * W), np.float32)
    row = 0
    for k in (1, 3, 5):
        hs, he = _adaptive_bins(HO, k)
        ws, we = _adaptive_bins(WO, k)
        for i in range(k):
            for j in range(k):
                area = float((he[i] - hs[i]) * (we[j] - ws[j]))
                for h in range(hs[i], he[i]):
                    for w in range(ws[j], we[j]):
                        M[row, h * W + w] = 1.0 / area
                row += 1
    return jnp.asarray(M, dtype=jnp.bfloat16)   # (35, HW) bf16, HW in lanes


def _silu(v):
    return v * jax.nn.sigmoid(v)


# ----------------------------- Pallas kernel -----------------------------

def _mscam_kernel(x_ref, wred_ref, mt_ref, wdw_ref, wexp_ref, o_ref,
                  *, N, W, HW, CR, LPAD):
    # x_ref   : (N, C1, HW)    f32   unpadded flat input, channel-major, spatial in lanes
    # wred_ref: (CR, 9*C1)     bf16  transposed 3x3 reduction-conv weights
    # mt_ref  : (35, HW)       bf16  fused adaptive-pool matrix, lane-dense
    # wdw_ref : (CR, 35)       f32   depthwise conv weights [w1 | w2 | w4]
    # wexp_ref: (C1, 3*CR)     f32   1x1 channel_expansion weights
    # o_ref   : (N, C1, HW)    f32
    C1 = x_ref.shape[1]

    # ---- channel_reduction: 3x3 VALID conv as ONE MXU matmul over the fused batch ----
    zpad = jnp.zeros((C1, LPAD), jnp.bfloat16)           # in-kernel zero pad (finite!)
    parts = []
    for n in range(N):                                   # N is tiny & static
        xb = x_ref[n].astype(jnp.bfloat16)               # cast ONCE, before the 9 shifts
        xp = jnp.concatenate([xb, zpad], axis=-1)        # (C1, HW + LPAD) bf16
        shifts = [xp[:, kh * W + kw: kh * W + kw + HW]   # 9 shifted spatial views (bf16)
                  for kh in range(3) for kw in range(3)]
        parts.append(jnp.concatenate(shifts, axis=0))    # (9*C1, HW)
    stacked = parts[0] if N == 1 else jnp.concatenate(parts, axis=1)   # (9*C1, N*HW)

    y = jnp.dot(wred_ref[...], stacked,
                preferred_element_type=jnp.float32)       # (CR, N*HW), f32 accumulate
    y = _silu(y).astype(jnp.bfloat16)                     # bf16 operand for pool matmul

    mt = mt_ref[...]                                      # (35, HW) bf16
    wdw = wdw_ref[...]                                    # (CR, 35) f32
    wexp = wexp_ref[...]                                  # (C1, 3*CR) f32

    for n in range(N):
        yn = y[:, n * HW:(n + 1) * HW]                    # (CR, HW) bf16, lane-aligned

        # --- adaptive avg pools (1, 3, 5) fused into one matmul (contract last dims);
        #     finite garbage at border columns is zeroed by mt's zero columns ----------
        pooled = jax.lax.dot_general(
            yn, mt, (((1,), (1,)), ((), ())),
            preferred_element_type=jnp.float32)           # (CR, 35) f32

        # --- depthwise 1x1 / 3x3 / 5x5 convs: per-channel weighted lane reductions ----
        prod = pooled * wdw                                               # (CR, 35) f32
        f1 = _silu(prod[:, 0:1])                                          # (CR, 1)
        f2 = _silu(jnp.sum(prod[:, 1:10], axis=1, keepdims=True))         # (CR, 1)
        f4 = _silu(jnp.sum(prod[:, 10:35], axis=1, keepdims=True))        # (CR, 1)

        # --- channel_expansion 1x1 conv as three partial dots (f32), sigmoid gate -----
        pre = (jnp.dot(wexp[:, 0:CR], f1, preferred_element_type=jnp.float32)
               + jnp.dot(wexp[:, CR:2 * CR], f2, preferred_element_type=jnp.float32)
               + jnp.dot(wexp[:, 2 * CR:3 * CR], f4, preferred_element_type=jnp.float32))
        gate = jax.nn.sigmoid(pre)                                        # (C1, 1) f32

        # --- gated output: re-load x from VMEM (don't keep f32 x live across matmuls),
        #     broadcast gate over spatial lanes, lane-dense full-width stores ----------
        o_ref[n] = x_ref[n] * gate


# ----------------------------- wrapper -----------------------------

def mscam_v5_forward(x_nchw, params):
    """params (PyTorch layouts): wred (CR,C1,3,3), w1 (CR,1,1,1), w2 (CR,1,3,3),
       w4 (CR,1,5,5), wexp (C1,3*CR,1,1)."""
    N, C1, H, W = x_nchw.shape
    CR = params["w1"].shape[0]
    HO, WO = H - 2, W - 2
    HW = H * W

    # lane-aligned in-kernel zero pad, big enough for the largest 3x3 shift offset
    LPAD = -(-(2 * W + 2) // 128) * 128
    # static guard (per review): the largest flat index touched from any VALID
    # conv-output position must stay inside the zero-padded tail.
    assert (HO - 1) * W + (WO - 1) + 2 * W + 2 <= HW + LPAD - 1

    # channel-major / spatial-in-lanes flat layout (pure layout plumbing, NO host pad)
    x_flat = x_nchw.reshape(N, C1, HW).astype(jnp.float32)

    # weight repacking (parameter setup, glue)
    wred_k = jnp.transpose(params["wred"], (0, 2, 3, 1)).reshape(CR, 9 * C1) \
                 .astype(jnp.bfloat16)                                    # (CR, 9*C1)
    wdw_k = jnp.concatenate([params["w1"].reshape(CR, 1),
                             params["w2"].reshape(CR, 9),
                             params["w4"].reshape(CR, 25)],
                            axis=1).astype(jnp.float32)                   # (CR, 35)
    wexp_k = params["wexp"].reshape(C1, 3 * CR).astype(jnp.float32)       # (C1, 3*CR)
    mt_k = _pool_matrix_full_grid(H, W, HO, WO)                           # (35, HW) bf16

    kernel = functools.partial(_mscam_kernel, N=N, W=W, HW=HW, CR=CR, LPAD=LPAD)

    out_flat = pl.pallas_call(
        kernel,
        out_shape=jax.ShapeDtypeStruct((N, C1, HW), jnp.float32),
        grid=(1,),                                       # fused batch: one grid step
        in_specs=[
            pl.BlockSpec((N, C1, HW), lambda i: (0, 0, 0)),    # x (unpadded, flat)
            pl.BlockSpec((CR, 9 * C1), lambda i: (0, 0)),      # reduction conv W
            pl.BlockSpec((35, HW), lambda i: (0, 0)),          # pool matrix, lane-dense
            pl.BlockSpec((CR, 35), lambda i: (0, 0)),          # depthwise weights
            pl.BlockSpec((C1, 3 * CR), lambda i: (0, 0)),      # expansion weights
        ],
        out_specs=pl.BlockSpec((N, C1, HW), lambda i: (0, 0, 0)),
        compiler_params=pltpu.CompilerParams(dimension_semantics=("arbitrary",)),
    )(x_flat, wred_k, mt_k, wdw_k, wexp_k)

    return out_flat.reshape(N, C1, H, W)   # NCHW, no transposes needed


# ----------------------------- pure-JAX reference (independent path) -----------------------------

def _ref_forward(x, params):
    def conv(inp, w, groups=1):
        return jax.lax.conv_general_dilated(
            inp, w, window_strides=(1, 1), padding="VALID",
            feature_group_count=groups,
            dimension_numbers=("NCHW", "OIHW", "NCHW"),
            precision=jax.lax.Precision.HIGHEST)

    def adaptive_pool(y, k):
        _, _, Hh, Ww = y.shape
        hs, he = _adaptive_bins(Hh, k)
        ws, we = _adaptive_bins(Ww, k)
        rows = []
        for i in range(k):
            cols = [jnp.mean(y[:, :, hs[i]:he[i], ws[j]:we[j]], axis=(2, 3))
                    for j in range(k)]
            rows.append(jnp.stack(cols, axis=-1))
        return jnp.stack(rows, axis=-2)   # (N, C, k, k)

    CR = params["w1"].shape[0]
    y = _silu(conv(x, params["wred"]))
    y1 = _silu(conv(adaptive_pool(y, 1), params["w1"], groups=CR))
    y2 = _silu(conv(adaptive_pool(y, 3), params["w2"], groups=CR))
    y4 = _silu(conv(adaptive_pool(y, 5), params["w4"], groups=CR))
    ycat = jnp.concatenate([y1, y2, y4], axis=1)
    gate = jax.nn.sigmoid(conv(ycat, params["wexp"]))
    return x * gate


# ----------------------------- main -----------------------------

if __name__ == "__main__":
    N, C1, H, W, CR = 2, 8, 16, 16, 4

    key = jax.random.PRNGKey(0)
    ks = jax.random.split(key, 6)
    x = jax.random.normal(ks[0], (N, C1, H, W), jnp.float32)
    params = {
        "wred": jax.random.normal(ks[1], (CR, C1, 3, 3), jnp.float32) * 0.2,
        "w1":   jax.random.normal(ks[2], (CR, 1, 1, 1), jnp.float32) * 0.5,
        "w2":   jax.random.normal(ks[3], (CR, 1, 3, 3), jnp.float32) * 0.3,
        "w4":   jax.random.normal(ks[4], (CR, 1, 5, 5), jnp.float32) * 0.2,
        "wexp": jax.random.normal(ks[5], (C1, 3 * CR, 1, 1), jnp.float32) * 0.3,
    }

    out = jax.block_until_ready(mscam_v5_forward(x, params))
    ref = jax.block_until_ready(_ref_forward(x, params))
    # tolerance accommodates the bf16 conv inputs and bf16 pooling matrix (both with
    # f32 accumulation) compared against the f32 Precision.HIGHEST reference.
    np.testing.assert_allclose(np.asarray(out), np.asarray(ref), rtol=1e-2, atol=1e-2)
    print("KERNEL_OK")
</pallas_src>

<mosaic_0001>
module attributes {stable_mosaic.version = 11 : i64} {
  func.func @_mscam_kernel(%arg0: i32, %arg1: memref<2x8x256xf32, #tpu.memory_space<vmem>>, %arg2: memref<4x72xbf16, #tpu.memory_space<vmem>>, %arg3: memref<35x256xbf16, #tpu.memory_space<vmem>>, %arg4: memref<4x35xf32, #tpu.memory_space<vmem>>, %arg5: memref<8x12xf32, #tpu.memory_space<vmem>>, %arg6: memref<2x8x256xf32, #tpu.memory_space<vmem>>) attributes {dimension_semantics = [#tpu.dimension_semantics<arbitrary>], iteration_bounds = array<i64: 1>, scalar_prefetch = 0 : i64, scratch_operands = 0 : i64, tpu.core_type = #tpu.core_type<tc>, window_params = [{pipeline_mode = #tpu.pipeline_mode<synchronous>, transform_indices = @transform_0, window_bounds = array<i64: 2, 8, 256>}, {pipeline_mode = #tpu.pipeline_mode<synchronous>, transform_indices = @transform_1, window_bounds = array<i64: 4, 72>}, {pipeline_mode = #tpu.pipeline_mode<synchronous>, transform_indices = @transform_2, window_bounds = array<i64: 35, 256>}, {pipeline_mode = #tpu.pipeline_mode<synchronous>, transform_indices = @transform_3, window_bounds = array<i64: 4, 35>}, {pipeline_mode = #tpu.pipeline_mode<synchronous>, transform_indices = @transform_4, window_bounds = array<i64: 8, 12>}, {pipeline_mode = #tpu.pipeline_mode<synchronous>, transform_indices = @transform_5, window_bounds = array<i64: 2, 8, 256>}]} {
    %cst = arith.constant 0.000000e+00 : bf16
    %0 = vector.broadcast %cst : bf16 to vector<8x128xbf16>
    %c0 = arith.constant 0 : index
    %c0_0 = arith.constant 0 : index
    %c0_1 = arith.constant 0 : index
    %1 = vector.load %arg1[%c0, %c0_0, %c0_1] : memref<2x8x256xf32, #tpu.memory_space<vmem>>, vector<1x8x256xf32>
    %2 = vector.shape_cast %1 : vector<1x8x256xf32> to vector<8x256xf32>
    %3 = arith.truncf %2 : vector<8x256xf32> to vector<8x256xbf16>
    %4 = tpu.concatenate %3, %0 in 1 : vector<8x256xbf16>, vector<8x128xbf16> -> vector<8x384xbf16>
    %5 = vector.extract_strided_slice %4 {offsets = [0, 0], sizes = [8, 256], strides = [1, 1]} : vector<8x384xbf16> to vector<8x256xbf16>
    %6 = vector.extract_strided_slice %4 {offsets = [0, 1], sizes = [8, 256], strides = [1, 1]} : vector<8x384xbf16> to vector<8x256xbf16>
    %7 = vector.extract_strided_slice %4 {offsets = [0, 2], sizes = [8, 256], strides = [1, 1]} : vector<8x384xbf16> to vector<8x256xbf16>
    %8 = vector.extract_strided_slice %4 {offsets = [0, 16], sizes = [8, 256], strides = [1, 1]} : vector<8x384xbf16> to vector<8x256xbf16>
    %9 = vector.extract_strided_slice %4 {offsets = [0, 17], sizes = [8, 256], strides = [1, 1]} : vector<8x384xbf16> to vector<8x256xbf16>
    %10 = vector.extract_strided_slice %4 {offsets = [0, 18], sizes = [8, 256], strides = [1, 1]} : vector<8x384xbf16> to vector<8x256xbf16>
    %11 = vector.extract_strided_slice %4 {offsets = [0, 32], sizes = [8, 256], strides = [1, 1]} : vector<8x384xbf16> to vector<8x256xbf16>
    %12 = vector.extract_strided_slice %4 {offsets = [0, 33], sizes = [8, 256], strides = [1, 1]} : vector<8x384xbf16> to vector<8x256xbf16>
    %13 = vector.extract_strided_slice %4 {offsets = [0, 34], sizes = [8, 256], strides = [1, 1]} : vector<8x384xbf16> to vector<8x256xbf16>
    %14 = tpu.concatenate %5, %6, %7, %8, %9, %10, %11, %12, %13 in 0 : vector<8x256xbf16>, vector<8x256xbf16>, vector<8x256xbf16>, vector<8x256xbf16>, vector<8x256xbf16>, vector<8x256xbf16>, vector<8x256xbf16>, vector<8x256xbf16>, vector<8x256xbf16> -> vector<72x256xbf16>
    %c1 = arith.constant 1 : index
    %c0_2 = arith.constant 0 : index
    %c0_3 = arith.constant 0 : index
    %15 = vector.load %arg1[%c1, %c0_2, %c0_3] : memref<2x8x256xf32, #tpu.memory_space<vmem>>, vector<1x8x256xf32>
    %16 = vector.shape_cast %15 : vector<1x8x256xf32> to vector<8x256xf32>
    %17 = arith.truncf %16 : vector<8x256xf32> to vector<8x256xbf16>
    %18 = tpu.concatenate %17, %0 in 1 : vector<8x256xbf16>, vector<8x128xbf16> -> vector<8x384xbf16>
    %19 = vector.extract_strided_slice %18 {offsets = [0, 0], sizes = [8, 256], strides = [1, 1]} : vector<8x384xbf16> to vector<8x256xbf16>
    %20 = vector.extract_strided_slice %18 {offsets = [0, 1], sizes = [8, 256], strides = [1, 1]} : vector<8x384xbf16> to vector<8x256xbf16>
    %21 = vector.extract_strided_slice %18 {offsets = [0, 2], sizes = [8, 256], strides = [1, 1]} : vector<8x384xbf16> to vector<8x256xbf16>
    %22 = vector.extract_strided_slice %18 {offsets = [0, 16], sizes = [8, 256], strides = [1, 1]} : vector<8x384xbf16> to vector<8x256xbf16>
    %23 = vector.extract_strided_slice %18 {offsets = [0, 17], sizes = [8, 256], strides = [1, 1]} : vector<8x384xbf16> to vector<8x256xbf16>
    %24 = vector.extract_strided_slice %18 {offsets = [0, 18], sizes = [8, 256], strides = [1, 1]} : vector<8x384xbf16> to vector<8x256xbf16>
    %25 = vector.extract_strided_slice %18 {offsets = [0, 32], sizes = [8, 256], strides = [1, 1]} : vector<8x384xbf16> to vector<8x256xbf16>
    %26 = vector.extract_strided_slice %18 {offsets = [0, 33], sizes = [8, 256], strides = [1, 1]} : vector<8x384xbf16> to vector<8x256xbf16>
    %27 = vector.extract_strided_slice %18 {offsets = [0, 34], sizes = [8, 256], strides = [1, 1]} : vector<8x384xbf16> to vector<8x256xbf16>
    %28 = tpu.concatenate %19, %20, %21, %22, %23, %24, %25, %26, %27 in 0 : vector<8x256xbf16>, vector<8x256xbf16>, vector<8x256xbf16>, vector<8x256xbf16>, vector<8x256xbf16>, vector<8x256xbf16>, vector<8x256xbf16>, vector<8x256xbf16>, vector<8x256xbf16> -> vector<72x256xbf16>
    %29 = tpu.concatenate %14, %28 in 1 : vector<72x256xbf16>, vector<72x256xbf16> -> vector<72x512xbf16>
    %c0_4 = arith.constant 0 : index
    %c0_5 = arith.constant 0 : index
    %30 = vector.load %arg2[%c0_4, %c0_5] : memref<4x72xbf16, #tpu.memory_space<vmem>>, vector<4x72xbf16>
    %cst_6 = arith.constant dense<0.000000e+00> : vector<4x512xf32>
    %31 = tpu.matmul %30, %29, %cst_6 {dimension_numbers = #tpu.dot_dimension_numbers<[1], [0], [0], [1], [0, 0, 1, 1], [], []>} : vector<4x72xbf16>, vector<72x512xbf16>, vector<4x512xf32> -> vector<4x512xf32>
    %32 = arith.negf %31 : vector<4x512xf32>
    %33 = math.exp %32 : vector<4x512xf32>
    %cst_7 = arith.constant 1.000000e+00 : f32
    %34 = vector.broadcast %cst_7 : f32 to vector<4x512xf32>
    %35 = arith.addf %34, %33 : vector<4x512xf32>
    %36 = arith.divf %34, %35 : vector<4x512xf32>
    %37 = arith.mulf %31, %36 : vector<4x512xf32>
    %38 = arith.truncf %37 : vector<4x512xf32> to vector<4x512xbf16>
    %c0_8 = arith.constant 0 : index
    %c0_9 = arith.constant 0 : index
    %39 = vector.load %arg3[%c0_8, %c0_9] : memref<35x256xbf16, #tpu.memory_space<vmem>>, vector<35x256xbf16>
    %c0_10 = arith.constant 0 : index
    %c0_11 = arith.constant 0 : index
    %40 = vector.load %arg4[%c0_10, %c0_11] : memref<4x35xf32, #tpu.memory_space<vmem>>, vector<4x35xf32>
    %c0_12 = arith.constant 0 : index
    %c0_13 = arith.constant 0 : index
    %41 = vector.load %arg5[%c0_12, %c0_13] : memref<8x12xf32, #tpu.memory_space<vmem>>, vector<8x12xf32>
    %42 = vector.extract_strided_slice %38 {offsets = [0, 0], sizes = [4, 256], strides = [1, 1]} : vector<4x512xbf16> to vector<4x256xbf16>
    %cst_14 = arith.constant dense<0.000000e+00> : vector<4x35xf32>
    %43 = tpu.matmul %42, %39, %cst_14 {dimension_numbers = #tpu.dot_dimension_numbers<[1], [1], [0], [0], [0, 0, 1, 0], [], []>} : vector<4x256xbf16>, vector<35x256xbf16>, vector<4x35xf32> -> vector<4x35xf32>
    %44 = arith.mulf %43, %40 : vector<4x35xf32>
    %45 = vector.extract_strided_slice %44 {offsets = [0, 0], sizes = [4, 1], strides = [1, 1]} : vector<4x35xf32> to vector<4x1xf32>
    %46 = arith.negf %45 : vector<4x1xf32>
    %47 = math.exp %46 : vector<4x1xf32>
    %cst_15 = arith.constant 1.000000e+00 : f32
    %48 = vector.broadcast %cst_15 : f32 to vector<4x1xf32>
    %49 = arith.addf %48, %47 : vector<4x1xf32>
    %50 = arith.divf %48, %49 : vector<4x1xf32>
    %51 = arith.mulf %45, %50 : vector<4x1xf32>
    %52 = vector.extract_strided_slice %44 {offsets = [0, 1], sizes = [4, 9], strides = [1, 1]} : vector<4x35xf32> to vector<4x9xf32>
    %cst_16 = arith.constant dense<0.000000e+00> : vector<4xf32>
    %53 = vector.multi_reduction <add>, %52, %cst_16 [1] : vector<4x9xf32> to vector<4xf32>
    %54 = vector.shape_cast %53 : vector<4xf32> to vector<4x1xf32>
    %55 = arith.negf %54 : vector<4x1xf32>
    %56 = math.exp %55 : vector<4x1xf32>
    %cst_17 = arith.constant 1.000000e+00 : f32
    %57 = vector.broadcast %cst_17 : f32 to vector<4x1xf32>
    %58 = arith.addf %57, %56 : vector<4x1xf32>
    %59 = arith.divf %57, %58 : vector<4x1xf32>
    %60 = arith.mulf %54, %59 : vector<4x1xf32>
    %61 = vector.extract_strided_slice %44 {offsets = [0, 10], sizes = [4, 25], strides = [1, 1]} : vector<4x35xf32> to vector<4x25xf32>
    %cst_18 = arith.constant dense<0.000000e+00> : vector<4xf32>
    %62 = vector.multi_reduction <add>, %61, %cst_18 [1] : vector<4x25xf32> to vector<4xf32>
    %63 = vector.shape_cast %62 : vector<4xf32> to vector<4x1xf32>
    %64 = arith.negf %63 : vector<4x1xf32>
    %65 = math.exp %64 : vector<4x1xf32>
    %cst_19 = arith.constant 1.000000e+00 : f32
    %66 = vector.broadcast %cst_19 : f32 to vector<4x1xf32>
    %67 = arith.addf %66, %65 : vector<4x1xf32>
    %68 = arith.divf %66, %67 : vector<4x1xf32>
    %69 = arith.mulf %63, %68 : vector<4x1xf32>
    %70 = vector.extract_strided_slice %41 {offsets = [0, 0], sizes = [8, 4], strides = [1, 1]} : vector<8x12xf32> to vector<8x4xf32>
    %cst_20 = arith.constant dense<0.000000e+00> : vector<8x1xf32>
    %71 = tpu.matmul %70, %51, %cst_20 {dimension_numbers = #tpu.dot_dimension_numbers<[1], [0], [0], [1], [0, 0, 1, 1], [], []>} : vector<8x4xf32>, vector<4x1xf32>, vector<8x1xf32> -> vector<8x1xf32>
    %72 = vector.extract_strided_slice %41 {offsets = [0, 4], sizes = [8, 4], strides = [1, 1]} : vector<8x12xf32> to vector<8x4xf32>
    %cst_21 = arith.constant dense<0.000000e+00> : vector<8x1xf32>
    %73 = tpu.matmul %72, %60, %cst_21 {dimension_numbers = #tpu.dot_dimension_numbers<[1], [0], [0], [1], [0, 0, 1, 1], [], []>} : vector<8x4xf32>, vector<4x1xf32>, vector<8x1xf32> -> vector<8x1xf32>
    %74 = arith.addf %71, %73 : vector<8x1xf32>
    %75 = vector.extract_strided_slice %41 {offsets = [0, 8], sizes = [8, 4], strides = [1, 1]} : vector<8x12xf32> to vector<8x4xf32>
    %cst_22 = arith.constant dense<0.000000e+00> : vector<8x1xf32>
    %76 = tpu.matmul %75, %69, %cst_22 {dimension_numbers = #tpu.dot_dimension_numbers<[1], [0], [0], [1], [0, 0, 1, 1], [], []>} : vector<8x4xf32>, vector<4x1xf32>, vector<8x1xf32> -> vector<8x1xf32>
    %77 = arith.addf %74, %76 : vector<8x1xf32>
    %78 = arith.negf %77 : vector<8x1xf32>
    %79 = math.exp %78 : vector<8x1xf32>
    %cst_23 = arith.constant 1.000000e+00 : f32
    %80 = vector.broadcast %cst_23 : f32 to vector<8x1xf32>
    %81 = arith.addf %80, %79 : vector<8x1xf32>
    %82 = arith.divf %80, %81 : vector<8x1xf32>
    %c0_24 = arith.constant 0 : index
    %c0_25 = arith.constant 0 : index
    %c0_26 = arith.constant 0 : index
    %83 = vector.load %arg1[%c0_24, %c0_25, %c0_26] : memref<2x8x256xf32, #tpu.memory_space<vmem>>, vector<1x8x256xf32>
    %84 = vector.shape_cast %83 : vector<1x8x256xf32> to vector<8x256xf32>
    %85 = vector.broadcast %82 : vector<8x1xf32> to vector<8x256xf32>
    %86 = arith.mulf %84, %85 : vector<8x256xf32>
    %c0_27 = arith.constant 0 : index
    %c0_28 = arith.constant 0 : index
    %c0_29 = arith.constant 0 : index
    %87 = vector.load %arg6[%c0_27, %c0_28, %c0_29] : memref<2x8x256xf32, #tpu.memory_space<vmem>>, vector<1x8x256xf32>
    %88 = vector.shape_cast %87 : vector<1x8x256xf32> to vector<8x256xf32>
    %89 = vector.shape_cast %86 : vector<8x256xf32> to vector<1x8x256xf32>
    tpu.vector_store %arg6[%c0_27, %c0_28, %c0_29], %89 {strides = array<i32>} : memref<2x8x256xf32, #tpu.memory_space<vmem>>, vector<1x8x256xf32>,
    %90 = vector.extract_strided_slice %38 {offsets = [0, 256], sizes = [4, 256], strides = [1, 1]} : vector<4x512xbf16> to vector<4x256xbf16>
    %cst_30 = arith.constant dense<0.000000e+00> : vector<4x35xf32>
    %91 = tpu.matmul %90, %39, %cst_30 {dimension_numbers = #tpu.dot_dimension_numbers<[1], [1], [0], [0], [0, 0, 1, 0], [], []>} : vector<4x256xbf16>, vector<35x256xbf16>, vector<4x35xf32> -> vector<4x35xf32>
    %92 = arith.mulf %91, %40 : vector<4x35xf32>
    %93 = vector.extract_strided_slice %92 {offsets = [0, 0], sizes = [4, 1], strides = [1, 1]} : vector<4x35xf32> to vector<4x1xf32>
    %94 = arith.negf %93 : vector<4x1xf32>
    %95 = math.exp %94 : vector<4x1xf32>
    %cst_31 = arith.constant 1.000000e+00 : f32
    %96 = vector.broadcast %cst_31 : f32 to vector<4x1xf32>
    %97 = arith.addf %96, %95 : vector<4x1xf32>
    %98 = arith.divf %96, %97 : vector<4x1xf32>
    %99 = arith.mulf %93, %98 : vector<4x1xf32>
    %100 = vector.extract_strided_slice %92 {offsets = [0, 1], sizes = [4, 9], strides = [1, 1]} : vector<4x35xf32> to vector<4x9xf32>
    %cst_32 = arith.constant dense<0.000000e+00> : vector<4xf32>
    %101 = vector.multi_reduction <add>, %100, %cst_32 [1] : vector<4x9xf32> to vector<4xf32>
    %102 = vector.shape_cast %101 : vector<4xf32> to vector<4x1xf32>
    %103 = arith.negf %102 : vector<4x1xf32>
    %104 = math.exp %103 : vector<4x1xf32>
    %cst_33 = arith.constant 1.000000e+00 : f32
    %105 = vector.broadcast %cst_33 : f32 to vector<4x1xf32>
    %106 = arith.addf %105, %104 : vector<4x1xf32>
    %107 = arith.divf %105, %106 : vector<4x1xf32>
    %108 = arith.mulf %102, %107 : vector<4x1xf32>
    %109 = vector.extract_strided_slice %92 {offsets = [0, 10], sizes = [4, 25], strides = [1, 1]} : vector<4x35xf32> to vector<4x25xf32>
    %cst_34 = arith.constant dense<0.000000e+00> : vector<4xf32>
    %110 = vector.multi_reduction <add>, %109, %cst_34 [1] : vector<4x25xf32> to vector<4xf32>
    %111 = vector.shape_cast %110 : vector<4xf32> to vector<4x1xf32>
    %112 = arith.negf %111 : vector<4x1xf32>
    %113 = math.exp %112 : vector<4x1xf32>
    %cst_35 = arith.constant 1.000000e+00 : f32
    %114 = vector.broadcast %cst_35 : f32 to vector<4x1xf32>
    %115 = arith.addf %114, %113 : vector<4x1xf32>
    %116 = arith.divf %114, %115 : vector<4x1xf32>
    %117 = arith.mulf %111, %116 : vector<4x1xf32>
    %118 = vector.extract_strided_slice %41 {offsets = [0, 0], sizes = [8, 4], strides = [1, 1]} : vector<8x12xf32> to vector<8x4xf32>
    %cst_36 = arith.constant dense<0.000000e+00> : vector<8x1xf32>
    %119 = tpu.matmul %118, %99, %cst_36 {dimension_numbers = #tpu.dot_dimension_numbers<[1], [0], [0], [1], [0, 0, 1, 1], [], []>} : vector<8x4xf32>, vector<4x1xf32>, vector<8x1xf32> -> vector<8x1xf32>
    %120 = vector.extract_strided_slice %41 {offsets = [0, 4], sizes = [8, 4], strides = [1, 1]} : vector<8x12xf32> to vector<8x4xf32>
    %cst_37 = arith.constant dense<0.000000e+00> : vector<8x1xf32>
    %121 = tpu.matmul %120, %108, %cst_37 {dimension_numbers = #tpu.dot_dimension_numbers<[1], [0], [0], [1], [0, 0, 1, 1], [], []>} : vector<8x4xf32>, vector<4x1xf32>, vector<8x1xf32> -> vector<8x1xf32>
    %122 = arith.addf %119, %121 : vector<8x1xf32>
    %123 = vector.extract_strided_slice %41 {offsets = [0, 8], sizes = [8, 4], strides = [1, 1]} : vector<8x12xf32> to vector<8x4xf32>
    %cst_38 = arith.constant dense<0.000000e+00> : vector<8x1xf32>
    %124 = tpu.matmul %123, %117, %cst_38 {dimension_numbers = #tpu.dot_dimension_numbers<[1], [0], [0], [1], [0, 0, 1, 1], [], []>} : vector<8x4xf32>, vector<4x1xf32>, vector<8x1xf32> -> vector<8x1xf32>
    %125 = arith.addf %122, %124 : vector<8x1xf32>
    %126 = arith.negf %125 : vector<8x1xf32>
    %127 = math.exp %126 : vector<8x1xf32>
    %cst_39 = arith.constant 1.000000e+00 : f32
    %128 = vector.broadcast %cst_39 : f32 to vector<8x1xf32>
    %129 = arith.addf %128, %127 : vector<8x1xf32>
    %130 = arith.divf %128, %129 : vector<8x1xf32>
    %c1_40 = arith.constant 1 : index
    %c0_41 = arith.constant 0 : index
    %c0_42 = arith.constant 0 : index
    %131 = vector.load %arg1[%c1_40, %c0_41, %c0_42] : memref<2x8x256xf32, #tpu.memory_space<vmem>>, vector<1x8x256xf32>
    %132 = vector.shape_cast %131 : vector<1x8x256xf32> to vector<8x256xf32>
    %133 = vector.broadcast %130 : vector<8x1xf32> to vector<8x256xf32>
    %134 = arith.mulf %132, %133 : vector<8x256xf32>
    %c1_43 = arith.constant 1 : index
    %c0_44 = arith.constant 0 : index
    %c0_45 = arith.constant 0 : index
    %135 = vector.load %arg6[%c1_43, %c0_44, %c0_45] : memref<2x8x256xf32, #tpu.memory_space<vmem>>, vector<1x8x256xf32>
    %136 = vector.shape_cast %135 : vector<1x8x256xf32> to vector<8x256xf32>
    %137 = vector.shape_cast %134 : vector<8x256xf32> to vector<1x8x256xf32>
    tpu.vector_store %arg6[%c1_43, %c0_44, %c0_45], %137 {strides = array<i32>} : memref<2x8x256xf32, #tpu.memory_space<vmem>>, vector<1x8x256xf32>,
    return
  }
  func.func @transform_0(%arg0: i32) -> (i32, i32, i32) {
    %c0_i32 = arith.constant 0 : i32
    %c0_i32_0 = arith.constant 0 : i32
    %c0_i32_1 = arith.constant 0 : i32
    %c0_i32_2 = arith.constant 0 : i32
    return %c0_i32, %c0_i32_0, %c0_i32_1 : i32, i32, i32
  }
  func.func @transform_1(%arg0: i32) -> (i32, i32) {
    %c0_i32 = arith.constant 0 : i32
    %c0_i32_0 = arith.constant 0 : i32
    %c0_i32_1 = arith.constant 0 : i32
    return %c0_i32, %c0_i32_0 : i32, i32
  }
  func.func @transform_2(%arg0: i32) -> (i32, i32) {
    %c0_i32 = arith.constant 0 : i32
    %c0_i32_0 = arith.constant 0 : i32
    %c0_i32_1 = arith.constant 0 : i32
    return %c0_i32, %c0_i32_0 : i32, i32
  }
  func.func @transform_3(%arg0: i32) -> (i32, i32) {
    %c0_i32 = arith.constant 0 : i32
    %c0_i32_0 = arith.constant 0 : i32
    %c0_i32_1 = arith.constant 0 : i32
    return %c0_i32, %c0_i32_0 : i32, i32
  }
  func.func @transform_4(%arg0: i32) -> (i32, i32) {
    %c0_i32 = arith.constant 0 : i32
    %c0_i32_0 = arith.constant 0 : i32
    %c0_i32_1 = arith.constant 0 : i32
    return %c0_i32, %c0_i32_0 : i32, i32
  }
  func.func @transform_5(%arg0: i32) -> (i32, i32, i32) {
    %c0_i32 = arith.constant 0 : i32
    %c0_i32_0 = arith.constant 0 : i32
    %c0_i32_1 = arith.constant 0 : i32
    %c0_i32_2 = arith.constant 0 : i32
    return %c0_i32, %c0_i32_0, %c0_i32_1 : i32, i32, i32
  }
}

</mosaic_0001>

<bundles_post_ra>
// kernel: tpu_custom_call.1
= control target key start
LH: loop header
LB: loop body
LE: loop exit
PB: predicated region body
PF: predicated region fallthrough
CT: control target
= control target key end

     0   :  { %10 = vsyncpa [#allocation3], 0  ;;  %s1685_s0 = inlined_call_operand.hbm [shape: f32[2,8,256], index: 0, kind: input, shape index: {}]   ;;  %s1686_s1 = inlined_call_operand.hbm [shape: bf16[4,72], index: 1, kind: input, shape index: {}]   ;;  %s1687_s2 = inlined_call_operand.hbm [shape: bf16[35,256], index: 2, kind: input, shape index: {}]   ;;  %s1688_s3 = inlined_call_operand.vmem [shape: f32[4,35], index: 3, kind: input, shape index: {}]   ;;  %s1689_s4 = inlined_call_operand.hbm [shape: f32[8,12], index: 4, kind: input, shape index: {}]   ;;  %s1690_s5 = inlined_call_operand.hbm [shape: f32[2,8,256], index: 5, kind: output, shape index: {}]  }
   0x1   :  { %11 = vsyncpa [#allocation6], 0 }
   0x2   :  { %12 = vsyncpa [#allocation9], 0 }
   0x3   :  { %13 = vsyncpa [#allocation4], 0  ;;  %s1363_s18 = smov [#allocation5]   ;;  %s1364_s20 = smov [#allocation2]  }
   0x4   :  { %s32_s19 = sshll.u32 %s1363_s18, 4  ;;  %s19_s21 = sshll.u32 %s1364_s20, 4  ;;  %s33_s19 = int_to_ptr.vmem [resolvable:$true] %s32_s19  ;;  %s20_s21 = int_to_ptr.vmem [resolvable:$true] %s19_s21 }
   0x5   :  { %s1263_s22 = scalar_lea.vmem %s33_s19, 32  ;;  %p1268_p1 = scmp.lt.s32.totalorder %s33_s19, %s33_s19 }
   0x6   :  { %p1264_p0 = scmp.ne.s32.totalorder %s33_s19, %s1263_s22  ;;  %p1269_p2 = scmp.lt.s32.totalorder %s1263_s22, %s1263_s22 }
   0x8   :  { %p1270_p3 = por %p1269_p2, %p1268_p1 }
   0xa   :  { %p1271_p4 = pnand %p1270_p3, %p1264_p0 }
   0xc   :  { %1274 = shalt.err (!%p1271_p4)
}
   0xd   :  { %35 = dma.hbm_to_vmem [thread:$0]  %s1686_s1, 32, %s33_s19, [#allocation6]  }
   0xe   :  { %s1283_s25 = scalar_lea.vmem %s20_s21, 512  ;;  %p1288_p6 = scmp.lt.s32.totalorder %s20_s21, %s20_s21 }
   0xf   :  { %p1284_p5 = scmp.ne.s32.totalorder %s20_s21, %s1283_s25  ;;  %p1289_p7 = scmp.lt.s32.totalorder %s1283_s25, %s1283_s25 }
  0x11   :  { %p1290_p8 = por %p1289_p7, %p1288_p6 }
  0x13   :  { %p1291_p9 = pnand %p1290_p8, %p1284_p5 }
  0x15   :  { %1294 = shalt.err (!%p1291_p9)
}
  0x16   :  { %s1365_s26 = smov 256   ;;  %s1366_s27 = smov 16  }
  0x17   :  { %25 = dma.hbm_to_vmem [thread:$0]  %s1685_s0, 512, %s20_s21, [#allocation3], %s1365_s26, %s1365_s26, %s1366_s27  }
  0x18   :  { %s1367_s30 = smov [#allocation7]  }
  0x19   :  { %s41_s6 = sshll.u32 %s1367_s30, 4  ;;  %s42_s6 = int_to_ptr.vmem [resolvable:$true] %s41_s6 }
  0x1a   :  { %s1303_s1 = scalar_lea.vmem %s42_s6, 640  ;;  %p1308_p11 = scmp.lt.s32.totalorder %s42_s6, %s42_s6 }
  0x1b   :  { %p1304_p10 = scmp.ne.s32.totalorder %s42_s6, %s1303_s1  ;;  %p1309_p12 = scmp.lt.s32.totalorder %s1303_s1, %s1303_s1 }
  0x1d   :  { %p1310_p13 = por %p1309_p12, %p1308_p11 }
  0x1f   :  { %p1311_p0 = pnand %p1310_p13, %p1304_p10 }
  0x21   :  { %1314 = shalt.err (!%p1311_p0)
}
  0x22   :  { %s1368_s7 = smov 128   ;;  %s1369_s8 = smov 8  }
  0x23   :  { %47 = dma.hbm_to_vmem [thread:$0]  %s1687_s2, 640, %s42_s6, [#allocation6], %s1368_s7, %s1368_s7, %s1369_s8  }
  0x24   :  { %s1370_s11 = smov [#allocation8]  }
  0x25   :  { %s56_s12 = sshll.u32 %s1370_s11, 4  ;;  %s57_s12 = int_to_ptr.vmem [resolvable:$true] %s56_s12 }
  0x26   :  { %s1323_s0 = scalar_lea.vmem %s57_s12, 128  ;;  %p1328_p2 = scmp.lt.s32.totalorder %s57_s12, %s57_s12 }
  0x27   :  { %p1324_p1 = scmp.ne.s32.totalorder %s57_s12, %s1323_s0  ;;  %p1329_p3 = scmp.lt.s32.totalorder %s1323_s0, %s1323_s0 }
  0x29   :  { %p1330_p4 = por %p1329_p3, %p1328_p2 }
  0x2b   :  { %p1331_p5 = pnand %p1330_p4, %p1324_p1 }
  0x2d   :  { %1334 = shalt.err (!%p1331_p5)
}
  0x2e   :  { %59 = dma.hbm_to_vmem [thread:$0]  %s1689_s4, 128, %s57_s12, [#allocation9]  }
  0x2f   :  { %1355 = dma.done.wait [#allocation3], 512  }
  0x30   :  { %1356 = vsyncadd [#allocation3], 4294966784 }
  0x31   :  { %1357 = dma.done.wait [#allocation6], 672  }
  0x32   :  { %1358 = vsyncadd [#allocation6], 4294966624 }
  0x33   :  { %1359 = dma.done.wait [#allocation9], 128  }
  0x34   :  { %1360 = vsyncadd [#allocation9], 4294967168  ;;  %v1371_v0 = vmov 0   ;;  %s1372_s2 = smov 96   ;;  %s1373_s15 = smov 94   ;;  %v1433_v1 = vld [vmem:[#allocation2 + $0x8] sm:$0xff] }
  0x35   :  { %132 = vrot.lane.b32.xlu0 %v1371_v0, %s1372_s2  ;;  %150 = vrot.lane.b32.xlu1 %v1371_v0, %s1373_s15  ;;  %v1435_v2 = vld [vmem:[#allocation2] sm:$0xff]  ;;  %v1439_v3 = vpack.c.bf16 %v1433_v1, %v1433_v1  ;;  %v82_v6 = vrot.slane %v1371_v0, 4  ;;  %s1374_s4 = smov 95   ;;  %s1375_s16 = smov 111   ;;  %v1472_v8 = vld [vmem:[#allocation2 + $0x18] sm:$0xff]  ;;  %v1474_v9 = vld [vmem:[#allocation2 + $0x10] sm:$0xff] }
  0x36   :  { %326 = vmatprep.mubr.bf16.mxu0 %v1371_v0  ;;  %367 = vmatprep.mubr.bf16.mxu1 %v1371_v0  ;;  %v1443_v4 = vpack.c.bf16 %v1435_v2, %v1435_v2  ;;  %s1376_s17 = smov 110   ;;  %s1377_s18 = smov 126   ;;  %v1480_v10 = vpack.c.bf16 %v1472_v8, %v1472_v8  ;;  %v1484_v11 = vpack.c.bf16 %v1474_v9, %v1474_v9  ;;  %vm152_vm0 = vcmask 769024  }
  0x37   :  { %1197 = vset.pattern.permute.xlu0 %v1371_v0  ;;  %1198 = vset.pattern.permute.xlu1 %v1371_v0  ;;  %v81_v5 = vrot.slane %v1439_v3, 4  ;;  %s1378_s19 = smov 112   ;;  %s1379_s20 = smov 127   ;;  %vm155_vm1 = vcmask 1043456   ;;  %vm134_vm2 = vcmask 785408   ;;  %vm143_vm3 = vcmask 777216  }
  0x38   :  { %v80_v7 = vrot.slane %v1443_v4, 4  ;;  %v196_v12 = vrot.slane %v1480_v10, 4  ;;  %v195_v13 = vrot.slane %v1484_v11, 4  ;;  %vm116_vm4 = vcmask 908288   ;;  %s1380_s23 = smov 118   ;;  %s1382_s24 = smov 124  }
  0x39   :  { %130 = vrot.lane.b32.xlu1 %v1439_v3, %s1372_s2  ;;  %146 = vrot.lane.b32.xlu0 %v1443_v4, %s1373_s15  ;;  %vm125_vm5 = vcmask 900096   ;;  %vm98_vm6 = vcmask 1031168   ;;  %vm107_vm7 = vcmask 916480   ;;  %vm89_vm8 = vcmask 1039360   ;;  %s1385_s25 = smov [#allocation10]  }
  0x3a   :  { %vm278_vm9 = vcmask 588800   ;;  %vm508_vm10 = vcmask 199680   ;;  %vm494_vm11 = vcmask 68608   ;;  %vm1384_vm12 = vmmov 0   ;;  %s1084_s28 = sshll.u32 %s1385_s25, 4  ;;  %s1085_s28 = int_to_ptr.vmem [resolvable:$true] %s1084_s28 }
  0x3b   :  { %vm522_vm13 = vcmask 31744   ;;  %s1335_s29 = scalar_lea.vmem %s1085_s28, 512  ;;  %p1340_p7 = scmp.lt.s32.totalorder %s1085_s28, %s1085_s28 }
  0x3c   :  { %p1336_p6 = scmp.ne.s32.totalorder %s1085_s28, %s1335_s29  ;;  %p1341_p8 = scmp.lt.s32.totalorder %s1335_s29, %s1335_s29 }
  0x3d   :  { %128 = vrot.lane.b32.xlu1 %v1443_v4, %s1372_s2  ;;  %148 = vrot.lane.b32.xlu0 %v1439_v3, %s1373_s15 }
  0x3e   :  { %p1342_p9 = por %p1341_p8, %p1340_p7 }
  0x40   :  { %p1343_p10 = pnand %p1342_p9, %p1336_p6 }
  0x41   :  { %139 = vrot.lane.b32.xlu1 %v81_v5, %s1374_s4  ;;  %141 = vrot.lane.b32.xlu0 %v82_v6, %s1374_s4 }
  0x45   :  { %112 = vrot.lane.b32.xlu1 %v1439_v3, %s1375_s16  ;;  %137 = vrot.lane.b32.xlu0 %v80_v7, %s1374_s4 }
  0x49   :  { %121 = vrot.lane.b32.xlu1 %v81_v5, %s1376_s17  ;;  %114 = vrot.lane.b32.xlu0 %v1371_v0, %s1375_s16 }
  0x4d   :  { %110 = vrot.lane.b32.xlu1 %v1443_v4, %s1375_s16  ;;  %123 = vrot.lane.b32.xlu0 %v82_v6, %s1376_s17 }
  0x51   :  { %94 = vrot.lane.b32.xlu1 %v1439_v3, %s1377_s18  ;;  %119 = vrot.lane.b32.xlu0 %v80_v7, %s1376_s17 }
  0x55   :  { %103 = vrot.lane.b32.xlu1 %v81_v5, %s1378_s19  ;;  %96 = vrot.lane.b32.xlu0 %v1371_v0, %s1377_s18 }
  0x59   :  { %92 = vrot.lane.b32.xlu1 %v1443_v4, %s1377_s18  ;;  %105 = vrot.lane.b32.xlu0 %v82_v6, %s1378_s19 }
  0x5d   :  { %85 = vrot.lane.b32.xlu1 %v81_v5, %s1379_s20  ;;  %101 = vrot.lane.b32.xlu0 %v80_v7, %s1378_s19  ;;  %v1550_v5 = vld [vmem:[#allocation5] sm:$0x3] }
  0x61   :  { %83 = vrot.lane.b32.xlu1 %v80_v7, %s1379_s20  ;;  %87 = vrot.lane.b32.xlu0 %v82_v6, %s1379_s20 }
  0x65   :  { %241 = vrot.lane.b32.xlu1 %v1480_v10, %s1373_s15  ;;  %239 = vrot.lane.b32.xlu0 %v1484_v11, %s1373_s15 }
  0x69   :  { %235 = vrot.lane.b32.xlu1 %v196_v12, %s1374_s4  ;;  %229 = vrot.lane.b32.xlu0 %v1480_v10, %s1372_s2 }
  0x6d   :  { %233 = vrot.lane.b32.xlu1 %v195_v13, %s1374_s4  ;;  %227 = vrot.lane.b32.xlu0 %v1484_v11, %s1372_s2 }
  0x71   :  { %223 = vrot.lane.b32.xlu1 %v196_v12, %s1376_s17  ;;  %217 = vrot.lane.b32.xlu0 %v1480_v10, %s1375_s16 }
  0x75   :  { %221 = vrot.lane.b32.xlu1 %v195_v13, %s1376_s17  ;;  %215 = vrot.lane.b32.xlu0 %v1484_v11, %s1375_s16 }
  0x79   :  { %211 = vrot.lane.b32.xlu1 %v196_v12, %s1378_s19  ;;  %205 = vrot.lane.b32.xlu0 %v1480_v10, %s1377_s18 }
  0x7d   :  { %203 = vrot.lane.b32.xlu0 %v1484_v11, %s1377_s18  ;;  %209 = vrot.lane.b32.xlu1 %v195_v13, %s1378_s19 }
  0x81   :  { %199 = vrot.lane.b32.xlu0 %v196_v12, %s1379_s20  ;;  %197 = vrot.lane.b32.xlu1 %v195_v13, %s1379_s20 }
  0xa7   :  { %v1510_v14 = vpop.permute.xlu0 %132  ;;  %v1512_v15 = vpop.permute.xlu1 %150 }
  0xab   :  { %v131_v16 = vpop.permute.xlu1 %130  ;;  %v147_v17 = vpop.permute.xlu0 %146 }
  0xac   :  { %v136_v25 = vsel %vm134_vm2, %v131_v16, %v1510_v14 }
  0xaf   :  { %v129_v18 = vpop.permute.xlu1 %128  ;;  %v149_v19 = vpop.permute.xlu0 %148 }
  0xb0   :  { %v154_v20 = vsel %vm152_vm0, %v149_v19, %v1512_v15  ;;  %v153_v21 = vsel %vm152_vm0, %v147_v17, %v149_v19  ;;  %v135_v30 = vsel %vm134_vm2, %v129_v18, %v131_v16 }
  0xb1   :  { %1098 = vmatprep.subr.msk.bf16.mxu0 %vm155_vm1, %v154_v20  ;;  %v283_v22 = vsel %vm155_vm1, %v153_v21, 0 }
  0xb2   :  { %301 = vmatpush1.bf16.msra.mxu0 %v283_v22 }
  0xb3   :  { %v140_v23 = vpop.permute.xlu1 %139  ;;  %v1519_v24 = vpop.permute.xlu0 %141 }
  0xb4   :  { %v145_v26 = vsel %vm143_vm3, %v140_v23, %v1519_v24 }
  0xb5   :  { %v186_v27 = vsel %vm155_vm1, %v136_v25, %v145_v26 }
  0xb6   :  { %302 = vmatprep.subr.bf16.mxu0 %v186_v27 }
  0xb7   :  { %v113_v28 = vpop.permute.xlu1 %112  ;;  %v138_v29 = vpop.permute.xlu0 %137 }
  0xb8   :  { %v144_v31 = vsel %vm143_vm3, %v138_v29, %v140_v23 }
  0xb9   :  { %v182_v32 = vsel %vm155_vm1, %v135_v30, %v144_v31 }
  0xba   :  { %303 = vmatpush1.bf16.msra.mxu0 %v182_v32 }
  0xbb   :  { %v122_v33 = vpop.permute.xlu1 %121  ;;  %v1529_v34 = vpop.permute.xlu0 %114 }
  0xbc   :  { %v118_v37 = vsel %vm116_vm4, %v113_v28, %v1529_v34 }
  0xbf   :  { %v111_v35 = vpop.permute.xlu1 %110  ;;  %v124_v36 = vpop.permute.xlu0 %123 }
  0xc0   :  { %v127_v38 = vsel %vm125_vm5, %v122_v33, %v124_v36  ;;  %v117_v42 = vsel %vm116_vm4, %v111_v35, %v113_v28 }
  0xc1   :  { %v178_v39 = vsel %vm155_vm1, %v118_v37, %v127_v38 }
  0xc2   :  { %304 = vmatprep.subr.bf16.mxu0 %v178_v39 }
  0xc3   :  { %v95_v40 = vpop.permute.xlu1 %94  ;;  %v120_v41 = vpop.permute.xlu0 %119 }
  0xc4   :  { %v126_v43 = vsel %vm125_vm5, %v120_v41, %v122_v33 }
  0xc5   :  { %v174_v44 = vsel %vm155_vm1, %v117_v42, %v126_v43 }
  0xc6   :  { %305 = vmatpush1.bf16.msra.mxu0 %v174_v44  ;;  %v412_v44 = vld [vmem:[#allocation7 + $0x20] sm:$0x33] }
  0xc7   :  { %v104_v45 = vpop.permute.xlu1 %103  ;;  %v97_v46 = vpop.permute.xlu0 %96 }
  0xc8   :  { %v100_v49 = vsel %vm98_vm6, %v95_v40, %v97_v46 }
  0xcb   :  { %v93_v47 = vpop.permute.xlu1 %92  ;;  %v106_v48 = vpop.permute.xlu0 %105 }
  0xcc   :  { %v109_v50 = vsel %vm107_vm7, %v104_v45, %v106_v48  ;;  %v99_v54 = vsel %vm98_vm6, %v93_v47, %v95_v40  ;;  %v1589_v47 = vld [vmem:[#allocation7 + $0x14] ss:$8 sps:$4 sm:$0xff]  }
  0xcd   :  { %v170_v51 = vsel %vm155_vm1, %v100_v49, %v109_v50  ;;  %v1595_v49 = vld [vmem:[#allocation7 + $0x4] ss:$8 sps:$4 sm:$0xff]  }
  0xce   :  { %306 = vmatprep.subr.bf16.mxu0 %v170_v51 }
  0xcf   :  { %v86_v52 = vpop.permute.xlu1 %85  ;;  %v102_v53 = vpop.permute.xlu0 %101 }
  0xd0   :  { %v108_v55 = vsel %vm107_vm7, %v102_v53, %v104_v45  ;;  %v1583_v45 = vcombine.high %v412_v44, %v412_v44 }
  0xd1   :  { %v166_v56 = vsel %vm155_vm1, %v99_v54, %v108_v55 }
  0xd2   :  { %307 = vmatpush1.bf16.msra.mxu0 %v166_v56 }
  0xd3   :  { %v84_v57 = vpop.permute.xlu1 %83  ;;  %v88_v58 = vpop.permute.xlu0 %87 }
  0xd4   :  { %v90_v59 = vsel %vm89_vm8, %v84_v57, %v86_v52  ;;  %v91_v60 = vsel %vm89_vm8, %v86_v52, %v88_v58 }
  0xd5   :  { %v162_v61 = vsel %vm155_vm1, %v1439_v3, %v91_v60  ;;  %v158_v62 = vsel %vm155_vm1, %v1443_v4, %v90_v59 }
  0xd6   :  { %308 = vmatprep.subr.bf16.mxu0 %v162_v61 }
  0xd7   :  { %v242_v63 = vpop.permute.xlu1 %241  ;;  %309 = vmatpush1.bf16.msra.mxu0 %v158_v62  ;;  %v240_v0 = vpop.permute.xlu0 %239 }
  0xd8   :  { %v244_v6 = vsel %vm152_vm0, %v242_v63, %v1512_v15  ;;  %v243_v7 = vsel %vm152_vm0, %v240_v0, %v242_v63  ;;  %452 = vmatprep.subr.bf16.mxu0 %v1583_v45 }
  0xd9   :  { %1100 = vmatprep.subr.msk.bf16.mxu1 %vm155_vm1, %v244_v6  ;;  %v289_v12 = vsel %vm155_vm1, %v243_v7, 0 }
  0xda   :  { %1099 = vmatmul.mubr.msk.bf16.vlgmr.msra.gmra.mxu0 %vm278_vm9, %v1550_v5  ;;  %342 = vmatpush1.bf16.msra.mxu1 %v289_v12 }
  0xdb   :  { %v236_v3 = vpop.permute.xlu1 %235  ;;  %v230_v4 = vpop.permute.xlu0 %229 }
  0xdc   :  { %v238_v13 = vsel %vm143_vm3, %v236_v3, %v1519_v24  ;;  %v232_v16 = vsel %vm134_vm2, %v230_v4, %v1510_v14 }
  0xdd   :  { %v275_v15 = vsel %vm155_vm1, %v232_v16, %v238_v13 }
  0xde   :  { %343 = vmatprep.subr.bf16.mxu1 %v275_v15 }
  0xdf   :  { %v234_v17 = vpop.permute.xlu1 %233  ;;  %v228_v18 = vpop.permute.xlu0 %227 }
  0xe0   :  { %v237_v19 = vsel %vm143_vm3, %v234_v17, %v236_v3  ;;  %v231_v20 = vsel %vm134_vm2, %v228_v18, %v230_v4  ;;  %v1609_v4 = vld [vmem:[%s1688_s3] sm:$0xf]  ;;  %s1381_s3 = smov 120  }
  0xe1   :  { %v271_v21 = vsel %vm155_vm1, %v231_v20, %v237_v19 }
  0xe2   :  { %344 = vmatpush1.bf16.msra.mxu1 %v271_v21 }
  0xe3   :  { %v224_v22 = vpop.permute.xlu1 %223  ;;  %v218_v23 = vpop.permute.xlu0 %217 }
  0xe4   :  { %v226_v25 = vsel %vm125_vm5, %v224_v22, %v124_v36  ;;  %v220_v24 = vsel %vm116_vm4, %v218_v23, %v1529_v34 }
  0xe5   :  { %v267_v14 = vsel %vm155_vm1, %v220_v24, %v226_v25  ;;  %v1618_v24 = vld [vmem:[#allocation8] sm:$0xff] }
  0xe6   :  { %345 = vmatprep.subr.bf16.mxu1 %v267_v14  ;;  %v1383_v14 = vmov 0.0  }
  0xe7   :  { %v222_v26 = vpop.permute.xlu1 %221  ;;  %v216_v27 = vpop.permute.xlu0 %215 }
  0xe8   :  { %v225_v28 = vsel %vm125_vm5, %v222_v26, %v224_v22  ;;  %v219_v29 = vsel %vm116_vm4, %v216_v27, %v218_v23 }
  0xe9   :  { %v263_v30 = vsel %vm155_vm1, %v219_v29, %v225_v28 }
  0xea   :  { %346 = vmatpush1.bf16.msra.mxu1 %v263_v30 }
  0xeb   :  { %v212_v31 = vpop.permute.xlu1 %211  ;;  %v206_v32 = vpop.permute.xlu0 %205 }
  0xec   :  { %v214_v33 = vsel %vm107_vm7, %v212_v31, %v106_v48  ;;  %v208_v35 = vsel %vm98_vm6, %v206_v32, %v97_v46  ;;  %v1585_v46 = vcombine.low %v412_v44, %v412_v44  ;;  %v1591_v48 = vld [vmem:[#allocation7 + $0x10] ss:$8 sps:$4 sm:$0xff]  }
  0xed   :  { %v259_v34 = vsel %vm155_vm1, %v208_v35, %v214_v33 }
  0xee   :  { %347 = vmatprep.subr.bf16.mxu1 %v259_v34  ;;  %453 = vmatpush1.bf16.xpose.msra.mxu0 %v1585_v46 }
  0xef   :  { %v204_v36 = vpop.permute.xlu0 %203  ;;  %v210_v37 = vpop.permute.xlu1 %209  ;;  %454 = vmatprep.subr.bf16.mxu0 %v1589_v47 }
  0xf0   :  { %v207_v38 = vsel %vm98_vm6, %v204_v36, %v206_v32  ;;  %v213_v39 = vsel %vm107_vm7, %v210_v37, %v212_v31 }
  0xf1   :  { %v255_v40 = vsel %vm155_vm1, %v207_v38, %v213_v39 }
  0xf2   :  { %348 = vmatpush1.bf16.msra.mxu1 %v255_v40 }
  0xf3   :  { %v200_v41 = vpop.permute.xlu0 %199  ;;  %v198_v7 = vpop.permute.xlu1 %197 }
  0xf4   :  { %v202_v42 = vsel %vm89_vm8, %v200_v41, %v88_v58  ;;  %v201_v12 = vsel %vm89_vm8, %v198_v7, %v200_v41 }
  0xf5   :  { %v251_v43 = vsel %vm155_vm1, %v1480_v10, %v202_v42  ;;  %v1597_v10 = vld [vmem:[#allocation7] ss:$8 sps:$4 sm:$0xff]   ;;  %v247_v3 = vsel %vm155_vm1, %v1484_v11, %v201_v12 }
  0xf6   :  { %349 = vmatprep.subr.bf16.mxu1 %v251_v43  ;;  %455 = vmatpush1.bf16.xpose.msra.mxu0 %v1591_v48 }
  0xf7   :  { %456 = vmatprep.subr.bf16.mxu0 %v1595_v49  ;;  %350 = vmatpush1.bf16.msra.mxu1 %v247_v3 }
  0xf8   :  { %1144 = vmatprep.subr.mxu1 %v1383_v14 }
  0xfa   :  { %1101 = vmatmul.mubr.msk.bf16.vlgmr.msra.gmra.mxu1 %vm278_vm9, %v1550_v5 }
  0xfb   :  { %1146 = vmatprep.mubr.msk.f32.mxu1 %vm1384_vm12, %v1383_v14 }
  0xfe   :  { %457 = vmatpush1.bf16.xpose.msra.mxu0 %v1597_v10 }
  0xff   :  { %1159 = vmatprep.subr.mxu0 %v1383_v14 }
 0x19a   :  { %v328_v50 = vpop.f32.mrf.mxu0 }
 0x19b   :  { %v1102_v51 = vmul.f32 -1.442695, %v328_v50 }
 0x19c   :  { %v330_v52 = vpop.f32.mrf.mxu0 }
 0x19d   :  { %1207 = vpow2.f32 %v1102_v51  ;;  %v1103_v53 = vmul.f32 -1.442695, %v330_v52 }
 0x19e   :  { %v332_v54 = vpop.f32.mrf.mxu0 }
 0x19f   :  { %1209 = vpow2.f32 %v1103_v53 }
 0x1a0   :  { %v333_v55 = vpop.f32.mrf.mxu0 }
 0x1aa   :  { %v1208_v56 = vpop.eup %1207 }
 0x1ab   :  { %v388_v57 = vadd.f32 1.0, %v1208_v56 }
 0x1ac   :  { %v1210_v58 = vpop.eup %1209 }
 0x1ad   :  { %1211 = vrcp.f32 %v388_v57  ;;  %v389_v59 = vadd.f32 1.0, %v1210_v58 }
 0x1af   :  { %1213 = vrcp.f32 %v389_v59 }
 0x1ba   :  { %v1212_v60 = vpop.eup %1211  ;;  %v1614_v18 = vpop.f32.mrf.mxu1 }
 0x1bb   :  { %v400_v62 = vmul.f32 %v1212_v60, %v328_v50  ;;  %v1104_v40 = vmul.f32 -1.442695, %v1614_v18 }
 0x1bc   :  { %v1214_v61 = vpop.eup %1213  ;;  %v371_v19 = vpop.f32.mrf.mxu1 }
 0x1bd   :  { %v401_v63 = vmul.f32 %v1214_v61, %v330_v52  ;;  %v404_v6 = vpack.c.bf16 %v400_v62, %v400_v62  ;;  %v1105_v27 = vmul.f32 -1.442695, %v371_v19 }
 0x1be   :  { %v373_v5 = vpop.f32.mrf.mxu1 }
 0x1bf   :  { %v405_v0 = vpack.c.bf16 %v401_v63, %v401_v63 }
 0x1c0   :  { %v374_v20 = vpop.f32.mrf.mxu1 }
 0x1c1   :  { %474 = vmatprep.mubr.bf16.mxu0 %v405_v0 }
 0x1c2   :  { %475 = vmatmul.mubr.bf16.vlgmr.msra.gmra.mxu0 %v404_v6 }
 0x1c3   :  { %1161 = vmatprep.mubr.msk.f32.mxu0 %vm1384_vm12, %v1383_v14 }
 0x282   :  { %v476_v13 = vpop.f32.mrf.mxu0 }
 0x283   :  { %v482_v16 = vmul.f32 %v476_v13, %v1609_v4 }
 0x284   :  { %v478_v15 = vpop.f32.mrf.mxu0 }
 0x285   :  { %505 = vrot.lane.b32.xlu1 %v482_v16, %s1380_s23  ;;  %491 = vrot.lane.b32.xlu0 %v482_v16, %s1379_s20  ;;  %v1112_v26 = vmul.f32 -1.442695, %v482_v16 }
 0x286   :  { %v479_v17 = vpop.f32.mrf.mxu0 }
 0x287   :  { %1215 = vpow2.f32 %v1112_v26 }
 0x288   :  { %v480_v11 = vpop.f32.mrf.mxu0  ;;  %1217 = vpow2.f32 %v1105_v27 }
 0x294   :  { %v1216_v32 = vpop.eup %1215 }
 0x295   :  { %v1218_v33 = vpop.eup %1217  ;;  %v486_v35 = vadd.f32 1.0, %v1216_v32 }
 0x296   :  { %v391_v38 = vadd.f32 1.0, %v1218_v33 }
 0x2f7   :  { %v506_v21 = vpop.permute.xlu1 %505  ;;  %v492_v22 = vpop.permute.xlu0 %491 }
 0x2f8   :  { %v509_v23 = vsel %vm508_vm10, %v506_v21, 0.0  ;;  %v495_v25 = vsel %vm494_vm11, %v492_v22, 0.0 }
 0x2f9   :  { %510 = vadd.xlane.f32.xlu1 %v509_v23  ;;  %496 = vadd.xlane.f32.xlu0 %v495_v25 }
 0x30a   :  { %673 = vrot.lane.b32.xlu1 %v1618_v24, %s1381_s3 }
 0x30f   :  { %520 = vrot.lane.b32.xlu0 %v1618_v24, %s1382_s24 }
 0x382   :  { %v511_v28 = vpop.xlane.xlu1 %510  ;;  %v497_v29 = vpop.xlane.xlu0 %496 }
 0x383   :  { %v1114_v30 = vmul.f32 -1.442695, %v511_v28  ;;  %v1113_v31 = vmul.f32 -1.442695, %v497_v29 }
 0x385   :  { %1219 = vpow2.f32 %v1114_v30 }
 0x386   :  { %1221 = vpow2.f32 %v1113_v31  ;;  %v1629_v44 = vpop.permute.xlu0 %520  ;;  %v1642_v56 = vpop.permute.xlu1 %673 }
 0x387   :  { %1223 = vrcp.f32 %v486_v35 }
 0x392   :  { %v1220_v34 = vpop.eup %1219 }
 0x393   :  { %v1222_v36 = vpop.eup %1221  ;;  %v515_v39 = vadd.f32 1.0, %v1220_v34 }
 0x394   :  { %v501_v37 = vadd.f32 1.0, %v1222_v36  ;;  %v1224_v41 = vpop.eup %1223 }
 0x395   :  { %v489_v51 = vmul.f32 %v1224_v41, %v482_v16 }
 0x396   :  { %1225 = vrcp.f32 %v501_v37 }
 0x397   :  { %1227 = vrcp.f32 %v391_v38 }
 0x398   :  { %1229 = vrcp.f32 %v515_v39 }
 0x399   :  { %1231 = vpow2.f32 %v1104_v40 }
 0x3a3   :  { %v1226_v42 = vpop.eup %1225 }
 0x3a4   :  { %v504_v43 = vmul.f32 %v1226_v42, %v497_v29  ;;  %v1228_v50 = vpop.eup %1227 }
 0x3a5   :  { %v1230_v52 = vpop.eup %1229  ;;  %v403_v54 = vmul.f32 %v1228_v50, %v371_v19 }
 0x3a6   :  { %1145 = vmatpush3.msk.msra.mxu1 %vm155_vm1, %v504_v43  ;;  %v1232_v53 = vpop.eup %1231  ;;  %v518_v55 = vmul.f32 %v1230_v52, %v511_v28 }
 0x3a7   :  { %1147 = vmatmul.mubr.msk.f32.vlgmr.msra.gmra.mxu1 %vm522_vm13, %v1629_v44  ;;  %1149 = vmatprep.subr.mxu1 %v1383_v14  ;;  %v390_v57 = vadd.f32 1.0, %v1232_v53  ;;  %v407_v58 = vpack.c.bf16 %v403_v54, %v403_v54 }
 0x3a8   :  { %1150 = vmatpush3.msk.msra.mxu1 %vm155_vm1, %v489_v51  ;;  %1151 = vmatprep.mubr.msk.f32.mxu1 %vm1384_vm12, %v1383_v14 }
 0x3a9   :  { %1154 = vmatprep.subr.mxu1 %v1383_v14  ;;  %1233 = vrcp.f32 %v390_v57 }
 0x3ab   :  { %1152 = vmatmul.mubr.msk.f32.vlgmr.msra.gmra.mxu1 %vm522_vm13, %v1618_v24 }
 0x3ac   :  { %1155 = vmatpush3.msk.msra.mxu1 %vm155_vm1, %v518_v55  ;;  %1156 = vmatprep.mubr.msk.f32.mxu1 %vm1384_vm12, %v1383_v14 }
 0x3ad   :  { %776 = vmatprep.subr.bf16.mxu1 %v1583_v45 }
 0x3af   :  { %1157 = vmatmul.mubr.msk.f32.vlgmr.msra.gmra.mxu1 %vm522_vm13, %v1642_v56 }
 0x3b0   :  { %777 = vmatpush1.bf16.xpose.msra.mxu1 %v1585_v46  ;;  %798 = vmatprep.mubr.bf16.mxu1 %v407_v58 }
 0x3b1   :  { %778 = vmatprep.subr.bf16.mxu1 %v1589_v47 }
 0x3b6   :  { %v1234_v59 = vpop.eup %1233 }
 0x3b7   :  { %v402_v60 = vmul.f32 %v1234_v59, %v1614_v18 }
 0x3b8   :  { %779 = vmatpush1.bf16.xpose.msra.mxu1 %v1591_v48 }
 0x3b9   :  { %780 = vmatprep.subr.bf16.mxu1 %v1595_v49  ;;  %v406_v45 = vpack.c.bf16 %v402_v60, %v402_v60 }
 0x3c0   :  { %781 = vmatpush1.bf16.xpose.msra.mxu1 %v1597_v10 }
 0x3c7   :  { %799 = vmatmul.mubr.bf16.vlgmr.msra.gmra.mxu1 %v406_v45 }
 0x467   :  { %v594_v61 = vpop.f32.mrf.mxu1 }
 0x469   :  { %v1148_v62 = vpop.f32.mrf.mxu1 }
 0x46b   :  { %v669_v63 = vpop.f32.mrf.mxu1 }
 0x46c   :  { %v670_v0 = vadd.f32 %v669_v63, %v594_v61 }
 0x46d   :  { %v1153_v46 = vpop.f32.mrf.mxu1 }
 0x46f   :  { %v746_v6 = vpop.f32.mrf.mxu1 }
 0x470   :  { %v750_v7 = vadd.f32 %v746_v6, %v670_v0 }
 0x471   :  { %v1158_v12 = vpop.f32.mrf.mxu1 }
 0x472   :  { %v1121_v13 = vmul.f32 -1.442695, %v750_v7 }
 0x474   :  { %1235 = vpow2.f32 %v1121_v13 }
 0x481   :  { %v1236_v18 = vpop.eup %1235 }
 0x482   :  { %v754_v19 = vadd.f32 1.0, %v1236_v18 }
 0x484   :  { %1237 = vrcp.f32 %v754_v19 }
 0x487   :  { %v800_v47 = vpop.f32.mrf.mxu1 }
 0x488   :  { %v806_v48 = vmul.f32 %v800_v47, %v1609_v4 }
 0x489   :  { %v802_v3 = vpop.f32.mrf.mxu1 }
 0x48a   :  { %828 = vrot.lane.b32.xlu1 %v806_v48, %s1380_s23  ;;  %815 = vrot.lane.b32.xlu0 %v806_v48, %s1379_s20  ;;  %v1122_v5 = vmul.f32 -1.442695, %v806_v48 }
 0x48b   :  { %v803_v49 = vpop.f32.mrf.mxu1 }
 0x48c   :  { %1239 = vpow2.f32 %v1122_v5 }
 0x48d   :  { %v804_v10 = vpop.f32.mrf.mxu1 }
 0x491   :  { %v1238_v4 = vpop.eup %1237 }
 0x499   :  { %v1240_v28 = vpop.eup %1239 }
 0x49a   :  { %v810_v29 = vadd.f32 1.0, %v1240_v28 }
 0x4fc   :  { %v829_v16 = vpop.permute.xlu1 %828  ;;  %v816_v15 = vpop.permute.xlu0 %815 }
 0x4fd   :  { %v831_v17 = vsel %vm508_vm10, %v829_v16, 0.0  ;;  %v818_v11 = vsel %vm494_vm11, %v816_v15, 0.0 }
 0x4fe   :  { %832 = vadd.xlane.f32.xlu1 %v831_v17  ;;  %819 = vadd.xlane.f32.xlu0 %v818_v11 }
 0x514   :  { %759 = vperm.xlu0 %1197, %v1238_v4  }
 0x587   :  { %v833_v20 = vpop.xlane.xlu1 %832  ;;  %v820_v21 = vpop.xlane.xlu0 %819 }
 0x588   :  { %v1124_v22 = vmul.f32 -1.442695, %v833_v20  ;;  %v1123_v23 = vmul.f32 -1.442695, %v820_v21 }
 0x58a   :  { %1241 = vpow2.f32 %v1124_v22 }
 0x58b   :  { %1243 = vpow2.f32 %v1123_v23 }
 0x58c   :  { %1245 = vrcp.f32 %v810_v29 }
 0x58f   :  { %v760_v25 = vpop.permute.xlu0 %759 }
 0x590   :  { %v762_v26 = vmul.f32 %v760_v25, %v1435_v2  ;;  %v763_v27 = vmul.f32 %v760_v25, %v1433_v1 }
 0x592   :  { %764 = vst [vmem:[#allocation10] sm:$0xff] %v762_v26  ;;  %765 = vst [vmem:[#allocation10 + $0x8] sm:$0xff] %v763_v27 }
 0x597   :  { %v1242_v30 = vpop.eup %1241 }
 0x598   :  { %v1244_v31 = vpop.eup %1243  ;;  %v837_v33 = vadd.f32 1.0, %v1242_v30 }
 0x599   :  { %v824_v32 = vadd.f32 1.0, %v1244_v31  ;;  %v1246_v35 = vpop.eup %1245 }
 0x59a   :  { %v813_v37 = vmul.f32 %v1246_v35, %v806_v48 }
 0x59b   :  { %1247 = vrcp.f32 %v824_v32 }
 0x59c   :  { %1249 = vrcp.f32 %v837_v33 }
 0x5a8   :  { %v1248_v34 = vpop.eup %1247 }
 0x5a9   :  { %v827_v36 = vmul.f32 %v1248_v34, %v820_v21  ;;  %v1250_v2 = vpop.eup %1249 }
 0x5aa   :  { %v840_v1 = vmul.f32 %v1250_v2, %v833_v20 }
 0x5ab   :  { %1160 = vmatpush3.msk.msra.mxu0 %vm155_vm1, %v827_v36 }
 0x5ac   :  { %1162 = vmatmul.mubr.msk.f32.vlgmr.msra.gmra.mxu0 %vm522_vm13, %v1629_v44  ;;  %1164 = vmatprep.subr.mxu0 %v1383_v14 }
 0x5ad   :  { %1165 = vmatpush3.msk.msra.mxu0 %vm155_vm1, %v813_v37  ;;  %1166 = vmatprep.mubr.msk.f32.mxu0 %vm1384_vm12, %v1383_v14 }
 0x5ae   :  { %1169 = vmatprep.subr.mxu0 %v1383_v14 }
 0x5b0   :  { %1167 = vmatmul.mubr.msk.f32.vlgmr.msra.gmra.mxu0 %vm522_vm13, %v1618_v24 }
 0x5b1   :  { %1170 = vmatpush3.msk.msra.mxu0 %vm155_vm1, %v840_v1  ;;  %1171 = vmatprep.mubr.msk.f32.mxu0 %vm1384_vm12, %v1383_v14 }
 0x5b4   :  { %1172 = vmatmul.mubr.msk.f32.vlgmr.msra.gmra.mxu0 %vm522_vm13, %v1642_v56 }
 0x66c   :  { %v910_v38 = vpop.f32.mrf.mxu0 }
 0x66e   :  { %v1163_v39 = vpop.f32.mrf.mxu0 }
 0x670   :  { %v983_v40 = vpop.f32.mrf.mxu0 }
 0x671   :  { %v984_v42 = vadd.f32 %v983_v40, %v910_v38 }
 0x672   :  { %v1168_v41 = vpop.f32.mrf.mxu0 }
 0x674   :  { %v1056_v43 = vpop.f32.mrf.mxu0 }
 0x675   :  { %v1060_v44 = vadd.f32 %v1056_v43, %v984_v42 }
 0x676   :  { %v1173_v50 = vpop.f32.mrf.mxu0 }
 0x677   :  { %v1131_v51 = vmul.f32 -1.442695, %v1060_v44 }
 0x679   :  { %1251 = vpow2.f32 %v1131_v51 }
 0x686   :  { %v1252_v52 = vpop.eup %1251 }
 0x687   :  { %v1064_v24 = vadd.f32 1.0, %v1252_v52 }
 0x689   :  { %1253 = vrcp.f32 %v1064_v24 }
 0x696   :  { %v1254_v53 = vpop.eup %1253 }
 0x697   :  { %1071 = vperm.xlu1 %1198, %v1254_v53  }
 0x712   :  { %v1072_v14 = vpop.permute.xlu1 %1071 }
 0x713   :  { %v1074_v54 = vmul.f32 %v1072_v14, %v1474_v9  ;;  %v1075_v55 = vmul.f32 %v1072_v14, %v1472_v8 }
 0x715   :  { %1077 = vst [vmem:[#allocation10 + $0x10] sm:$0xff] %v1074_v54  ;;  %1078 = vst [vmem:[#allocation10 + $0x18] sm:$0xff] %v1075_v55 }
 0x716   :  { %1346 = shalt.err (!%p1343_p10)
}
 0x717   :  { %1090 = dma.vmem_to_hbm [thread:$0]  %s1085_s28, 512, %s1690_s5, [#allocation4], %s1365_s26, %s1365_s26, %s1366_s27  }
 0x718   :  { %1361 = dma.done.wait [#allocation4], 512  }
 0x719   :  { %1362 = vsyncadd [#allocation4], 4294966784 }
 0x71a   :  { %1094 = vsyncpa [#allocation3], 1 }
 0x71b   :  { %1095 = vsyncpa [#allocation6], 1 }
 0x71c   :  { %1096 = vsyncpa [#allocation9], 1 }
 0x71d   :  { %1097 = vsyncpa [#allocation4], 1 }

</bundles_post_ra>
